<compile_context>
chip_gen: v6e
topology: v6e:2x2x1
jax: 0.10.0
libtpu: 0.0.40
codegen_flags: <defaults>
</compile_context>

<pallas_src>
import functools

import jax
import jax.numpy as jnp
from jax.experimental import pallas as pl
from jax.experimental.pallas import tpu as pltpu


def _round_up(v, m):
    return (v + m - 1) // m * m


def _device_kind():
    try:
        return jax.devices()[0].device_kind.lower()
    except Exception:  # pragma: no cover - CPU fallback / odd runtimes
        return ""


def _pick_row_tile(n, cap):
    """Largest power-of-two row tile <= cap whose pad waste stays small
    (review item: n=257 with tm=256 would otherwise pad to 512 rows)."""
    best = 8
    for tm in (8, 16, 32, 64, 128, 256, 512):
        if tm > cap:
            break
        if _round_up(n, tm) - n <= max(n // 8, 7):
            best = tm
    return best


def _unfused_tiles(n, tm):
    """(n_p, tk) for the contraction-tiled per-layer kernel."""
    n_p = _round_up(n, tm)
    if n_p <= 128:
        return n_p, n_p                      # single K step, tk == full dim
    n_p = _round_up(n, max(tm, 128))
    for tk in (512, 256, 128):
        if n_p % tk == 0:
            return n_p, tk
    return n_p, 128                          # unreachable (n_p is 128-multiple)


def build_scaled_laplacian(edge_index, edge_weight, num_nodes):
    """Dense S = -D^{-1/2} A D^{-1/2} (PyG ChebConv __norm__, lambda_max=2)."""
    src, dst = edge_index[0], edge_index[1]
    if edge_weight is None:
        edge_weight = jnp.ones(src.shape, jnp.float32)
    # remove_self_loops
    w = jnp.where(src != dst, edge_weight.astype(jnp.float32), 0.0)
    deg = jnp.zeros((num_nodes,), jnp.float32).at[src].add(w)
    dinv = jnp.where(deg > 0, jax.lax.rsqrt(deg), 0.0)
    norm = -dinv[src] * w * dinv[dst]
    # (S x)[i] = sum over edges (j -> i) of norm_e * x[j]
    s = jnp.zeros((num_nodes, num_nodes), jnp.float32).at[dst, src].add(norm)
    return s


def glorot(key, fan_in, fan_out):
    a = (6.0 / (fan_in + fan_out)) ** 0.5
    return jax.random.uniform(key, (fan_in, fan_out), jnp.float32, -a, a)


def _pad2(a, rows, cols, dtype):
    out = jnp.zeros((rows, cols), dtype)
    return out.at[:a.shape[0], :a.shape[1]].set(a.astype(dtype))


def _cat_weights(w0, w1, fin, fin_p, fout, fout_p, dtype):
    """Stacked [W0 ; W1], each zero-padded to (fin_p, fout_p)."""
    w = jnp.zeros((2 * fin_p, fout_p), dtype)
    w = w.at[:fin, :fout].set(w0.astype(dtype))
    w = w.at[fin_p:fin_p + fin, :fout].set(w1.astype(dtype))
    return w


def _cheb_mix(feat_tile, s_feat, w_ref, fin_p, split_k_dot):
    """x @ W0 + (S x) @ W1 with W = [W0 ; W1] stacked along K.

    split_k_dot=True uses two accumulated K=fin_p dots (v5e: MXU is 128 deep
    so the long dot splits anyway; skipping the lane concat saves a VMEM copy).
    split_k_dot=False uses the single concatenated K=2*fin_p dot (v6e/v7x).
    """
    if split_k_dot:
        return (jnp.dot(feat_tile, w_ref[:fin_p, :],
                        preferred_element_type=jnp.float32)
                + jnp.dot(s_feat, w_ref[fin_p:, :],
                          preferred_element_type=jnp.float32))
    cat = jnp.concatenate([feat_tile, s_feat], axis=-1)
    return jnp.dot(cat, w_ref[...], preferred_element_type=jnp.float32)


# ---------------------------------------------------------------------------
# Fused two-layer kernel (single pallas_call, hidden h lives in VMEM scratch).
# ---------------------------------------------------------------------------
def _fused_cheb_gnn_kernel(x_ref, s_ref, w1_ref, b1_ref, w2_ref, b2_ref,
                           o_ref, h_ref, *, tm, f_in_p, hid_p, s_resident,
                           split_k_dot):
    """Grid = (phase, row_tile).
      phase 0: h[rows]   = relu([x | S@x] @ W1cat + b1)  -> VMEM scratch h_ref
      phase 1: out[rows] =      [h | S@h] @ W2cat + b2   -> o_ref
    """
    phase = pl.program_id(0)
    i = pl.program_id(1)
    row0 = pl.multiple_of(i * tm, tm)

    def s_tile():
        if s_resident:                       # S fetched once, slice the row tile
            return s_ref[pl.ds(row0, tm), :]
        return s_ref[...]                    # streamed (tm, n_p) strip

    @pl.when(phase == 0)
    def _layer1():
        sx = jnp.dot(s_tile(), x_ref[...], preferred_element_type=jnp.float32)
        x_tile = x_ref[pl.ds(row0, tm), :]
        h = _cheb_mix(x_tile, sx.astype(x_tile.dtype), w1_ref, f_in_p,
                      split_k_dot)
        h = jnp.maximum(h + b1_ref[...], 0.0)          # f32 epilogue
        h_ref[pl.ds(row0, tm), :] = h.astype(h_ref.dtype)
        # NOTE: no o_ref store in phase 0 — the output block index is pinned to
        # block 0 for the whole phase and only written (and written back to
        # HBM) in phase 1, so there is no wasted zero-block writeback traffic.

    @pl.when(phase == 1)
    def _layer2():
        sh = jnp.dot(s_tile(), h_ref[...], preferred_element_type=jnp.float32)
        h_tile = h_ref[pl.ds(row0, tm), :]
        out = _cheb_mix(h_tile, sh.astype(h_tile.dtype), w2_ref, hid_p,
                        split_k_dot)
        o_ref[...] = (out + b2_ref[...]).astype(o_ref.dtype)


# ---------------------------------------------------------------------------
# Unfused single-layer kernel ("parallel" row axis, contraction-tiled S@x).
# ---------------------------------------------------------------------------
def _cheb_layer_kernel(xr_ref, s_ref, xk_ref, w_ref, b_ref, o_ref, sx_ref, *,
                       fin_p, relu, split_k_dot):
    """Grid = (row_tile i [parallel], contraction tile k [arbitrary]).
    Accumulates S@x over k in an f32 scratch, finishes the layer at last k."""
    k = pl.program_id(1)

    @pl.when(k == 0)
    def _init():
        sx_ref[...] = jnp.zeros_like(sx_ref)

    sx_ref[...] += jnp.dot(s_ref[...], xk_ref[...],
                           preferred_element_type=jnp.float32)

    @pl.when(k == pl.num_programs(1) - 1)
    def _finish():
        x_tile = xr_ref[...]
        out = _cheb_mix(x_tile, sx_ref[...].astype(x_tile.dtype), w_ref,
                        fin_p, split_k_dot)
        out = out + b_ref[...]
        if relu:
            out = jnp.maximum(out, 0.0)
        o_ref[...] = out.astype(o_ref.dtype)


def _cheb_layer(x_p, s_p, wcat, b, *, tm, tk, fout_p, relu, split_k_dot,
                out_dtype):
    """One ChebConv (K=2) layer as a pallas_call; row axis is 'parallel'."""
    n_p, fin_p = x_p.shape
    cbytes = x_p.dtype.itemsize
    obytes = jnp.dtype(out_dtype).itemsize

    footprint = (2 * tm * fin_p * cbytes          # x row tile (double-buffered)
                 + 2 * tk * fin_p * cbytes        # x contraction tile
                 + 2 * tm * tk * cbytes           # S tile
                 + 2 * 2 * fin_p * fout_p * cbytes
                 + 2 * fout_p * 4                 # bias
                 + tm * fin_p * 4                 # sx accumulator scratch
                 + 2 * tm * fout_p * obytes)      # out block
    vmem_limit = int(min(max(2 * footprint, 16 << 20), 64 << 20))

    flops = 2 * n_p * n_p * fin_p + 2 * n_p * (2 * fin_p) * fout_p
    bytes_accessed = ((n_p * fin_p + (n_p // tm) * n_p * fin_p) * cbytes
                      + n_p * n_p * cbytes
                      + 2 * fin_p * fout_p * cbytes + fout_p * 4
                      + n_p * fout_p * obytes)

    kernel = functools.partial(_cheb_layer_kernel, fin_p=fin_p, relu=relu,
                               split_k_dot=split_k_dot)
    return pl.pallas_call(
        kernel,
        out_shape=jax.ShapeDtypeStruct((n_p, fout_p), out_dtype),
        grid_spec=pltpu.PrefetchScalarGridSpec(
            num_scalar_prefetch=0,
            grid=(n_p // tm, n_p // tk),          # (node rows, S contraction)
            in_specs=[
                pl.BlockSpec((tm, fin_p), lambda i, k: (i, 0)),      # x rows (T0)
                pl.BlockSpec((tm, tk), lambda i, k: (i, k)),         # S tile
                pl.BlockSpec((tk, fin_p), lambda i, k: (k, 0)),      # x contraction
                pl.BlockSpec((2 * fin_p, fout_p), lambda i, k: (0, 0)),  # [W0;W1]
                pl.BlockSpec((1, fout_p), lambda i, k: (0, 0)),          # bias
            ],
            out_specs=pl.BlockSpec((tm, fout_p), lambda i, k: (i, 0)),
            scratch_shapes=[pltpu.VMEM((tm, fin_p), jnp.float32)],   # S@x acc
        ),
        compiler_params=pltpu.CompilerParams(
            dimension_semantics=("parallel", "arbitrary"),
            vmem_limit_bytes=vmem_limit),
        cost_estimate=pl.CostEstimate(flops=int(flops), transcendentals=0,
                                      bytes_accessed=int(bytes_accessed)),
    )(x_p, s_p, x_p, wcat, b)


# ---------------------------------------------------------------------------
# Forward wrapper.
# ---------------------------------------------------------------------------
def gnn_forward(x, edge_index, edge_weight, params, *,
                compute_dtype=jnp.bfloat16, out_dtype=jnp.float32,
                row_tile=256, fuse_layers=None, split_k_dot=None,
                vmem_budget_bytes=40 * 1024 * 1024):
    """ChebNet forward (eval mode: dropout p=0.5 is identity).

    fuse_layers=None  -> auto: fused single pallas_call on 1-TC chips
                         (v5e/v6e); per-layer 'parallel' kernels on v7x or
                         when the fused footprint exceeds the VMEM budget.
    split_k_dot=None  -> auto: two accumulated K-dots on v5e, concatenated
                         K=2*fin dot on v6e/v7x.
    """
    n, f_in = x.shape
    hid = params["w0_1"].shape[1]
    f_out = params["w0_2"].shape[1]

    kind = _device_kind()
    if split_k_dot is None:
        split_k_dot = "v5" in kind
    if fuse_layers is None:
        fuse_layers = "v7" not in kind        # v7x: 2 TCs -> prefer 'parallel'

    s = build_scaled_laplacian(edge_index, edge_weight, n)

    f_in_p = _round_up(f_in, 128)
    hid_p = _round_up(hid, 128)
    f_out_p = _round_up(f_out, 128)
    cbytes = jnp.dtype(compute_dtype).itemsize
    obytes = jnp.dtype(out_dtype).itemsize
    tm = _pick_row_tile(n, row_tile)

    # Weights / biases (biases stay f32 for the f32 epilogue).
    w1cat = _cat_weights(params["w0_1"], params["w1_1"], f_in, f_in_p,
                         hid, hid_p, compute_dtype)
    w2cat = _cat_weights(params["w0_2"], params["w1_2"], hid, hid_p,
                         f_out, f_out_p, compute_dtype)
    b1_p = _pad2(params["b_1"], 1, hid_p, jnp.float32)
    b2_p = _pad2(params["b_2"], 1, f_out_p, jnp.float32)

    if fuse_layers:
        n_p = _round_up(n, tm)

        def fused_vmem(s_res):
            s_blk = n_p * n_p if s_res else tm * n_p
            return (n_p * hid_p * cbytes                       # h scratch
                    + 2 * n_p * f_in_p * cbytes                # resident x
                    + 2 * s_blk * cbytes                       # S buffers
                    + 2 * (2 * f_in_p * hid_p + 2 * hid_p * f_out_p) * cbytes
                    + 2 * (hid_p + f_out_p) * 4                # biases
                    + 2 * tm * f_out_p * obytes)               # out blocks

        s_resident = fused_vmem(True) <= vmem_budget_bytes
        footprint = fused_vmem(s_resident)
        if footprint > vmem_budget_bytes:
            fuse_layers = False               # fall back to per-layer kernels

    if fuse_layers:
        x_p = _pad2(x, n_p, f_in_p, compute_dtype)
        s_p = _pad2(s, n_p, n_p, compute_dtype)

        if s_resident:
            # Fetched once, resident for both phases (no 2x HBM S stream).
            s_spec = pl.BlockSpec((n_p, n_p), lambda p, i: (0, 0))
        else:
            s_spec = pl.BlockSpec((tm, n_p), lambda p, i: (i, 0))

        flops = (2 * n_p * n_p * f_in_p + 2 * n_p * (2 * f_in_p) * hid_p
                 + 2 * n_p * n_p * hid_p + 2 * n_p * (2 * hid_p) * f_out_p)
        bytes_accessed = (n_p * f_in_p * cbytes
                          + (1 if s_resident else 2) * n_p * n_p * cbytes
                          + (2 * f_in_p * hid_p + 2 * hid_p * f_out_p) * cbytes
                          + (hid_p + f_out_p) * 4
                          + n_p * f_out_p * obytes)
        vmem_limit = int(min(max(2 * footprint, 16 << 20), 64 << 20))

        kernel = functools.partial(
            _fused_cheb_gnn_kernel, tm=tm, f_in_p=f_in_p, hid_p=hid_p,
            s_resident=s_resident, split_k_dot=split_k_dot)
        out_p = pl.pallas_call(
            kernel,
            out_shape=jax.ShapeDtypeStruct((n_p, f_out_p), out_dtype),
            grid_spec=pltpu.PrefetchScalarGridSpec(
                num_scalar_prefetch=0,
                grid=(2, n_p // tm),          # (layer phase, node-row tile)
                in_specs=[
                    pl.BlockSpec((n_p, f_in_p), lambda p, i: (0, 0)),        # x
                    s_spec,                                                   # S
                    pl.BlockSpec((2 * f_in_p, hid_p), lambda p, i: (0, 0)),   # W1cat
                    pl.BlockSpec((1, hid_p), lambda p, i: (0, 0)),            # b1
                    pl.BlockSpec((2 * hid_p, f_out_p), lambda p, i: (0, 0)),  # W2cat
                    pl.BlockSpec((1, f_out_p), lambda p, i: (0, 0)),          # b2
                ],
                # Phase 0 is pinned to output block 0 and never writes it; only
                # phase 1 writes (and writes back) real output blocks.
                out_specs=pl.BlockSpec((tm, f_out_p), lambda p, i: (i * p, 0)),
                scratch_shapes=[pltpu.VMEM((n_p, hid_p), compute_dtype)],
            ),
            compiler_params=pltpu.CompilerParams(
                dimension_semantics=("arbitrary", "arbitrary"),
                vmem_limit_bytes=vmem_limit),
            cost_estimate=pl.CostEstimate(flops=int(flops), transcendentals=0,
                                          bytes_accessed=int(bytes_accessed)),
        )(x_p, s_p, w1cat, b1_p, w2cat, b2_p)
        return out_p[:n, :f_out]

    # ----- Unfused per-layer path (v7x dual-TC / very large graphs) -----
    n_p, tk = _unfused_tiles(n, tm)
    x_p = _pad2(x, n_p, f_in_p, compute_dtype)
    s_p = _pad2(s, n_p, n_p, compute_dtype)
    # Padded h rows equal relu(b1) (nonzero); this stays correct because the
    # padded *columns* of S are zero, so they never leak into real rows.
    h_p = _cheb_layer(x_p, s_p, w1cat, b1_p, tm=tm, tk=tk, fout_p=hid_p,
                      relu=True, split_k_dot=split_k_dot,
                      out_dtype=compute_dtype)
    out_p = _cheb_layer(h_p, s_p, w2cat, b2_p, tm=tm, tk=tk, fout_p=f_out_p,
                        relu=False, split_k_dot=split_k_dot,
                        out_dtype=out_dtype)
    return out_p[:n, :f_out]


def gnn_forward_ref(x, edge_index, edge_weight, params):
    """Pure-JAX f32 reference for correctness checking."""
    n = x.shape[0]
    s = build_scaled_laplacian(edge_index, edge_weight, n)
    h = x @ params["w0_1"] + (s @ x) @ params["w1_1"] + params["b_1"]
    h = jnp.maximum(h, 0.0)
    out = h @ params["w0_2"] + (s @ h) @ params["w1_2"] + params["b_2"]
    return out


if __name__ == "__main__":
    N = 16            # number of nodes
    in_ch, hid_ch, out_ch = 8, 32, 8

    key = jax.random.PRNGKey(0)
    k_x, k10, k11, k20, k21 = jax.random.split(key, 5)

    # node features
    x = jax.random.normal(k_x, (N, in_ch), jnp.float32)

    # bidirectional ring graph: E = 2N edges, edge_weight = None (-> ones)
    idx = jnp.arange(N, dtype=jnp.int32)
    src = jnp.concatenate([idx, (idx + 1) % N])
    dst = jnp.concatenate([(idx + 1) % N, idx])
    edge_index = jnp.stack([src, dst])
    edge_weight = None

    # ChebConv params (glorot weights, zero bias), stored as [in, out]
    params = {
        "w0_1": glorot(k10, in_ch, hid_ch),
        "w1_1": glorot(k11, in_ch, hid_ch),
        "b_1": jnp.zeros((1, hid_ch), jnp.float32),
        "w0_2": glorot(k20, hid_ch, out_ch),
        "w1_2": glorot(k21, hid_ch, out_ch),
        "b_2": jnp.zeros((1, out_ch), jnp.float32),
    }

    ref = gnn_forward_ref(x, edge_index, edge_weight, params)

    # Fused single-kernel path, f32 operands: tight check.
    out_f32 = jax.block_until_ready(
        gnn_forward(x, edge_index, edge_weight, params,
                    compute_dtype=jnp.float32, fuse_layers=True))
    assert out_f32.shape == (N, out_ch)
    assert jnp.allclose(out_f32, ref, atol=1e-4, rtol=1e-4), "fused f32 mismatch"

    # Default fast path: bf16 operands / f32 MXU accumulation, bf16 output.
    out_bf16 = jax.block_until_ready(
        gnn_forward(x, edge_index, edge_weight, params,
                    compute_dtype=jnp.bfloat16, out_dtype=jnp.bfloat16))
    assert out_bf16.shape == (N, out_ch)
    assert jnp.allclose(out_bf16.astype(jnp.float32), ref,
                        atol=5e-2, rtol=5e-2), "bf16 mismatch"

    # Unfused per-layer path ('parallel' row axis, contraction-tiled S) with
    # the split-K dot variant — exercises the v5e / v7x code paths everywhere.
    out_unfused = jax.block_until_ready(
        gnn_forward(x, edge_index, edge_weight, params,
                    compute_dtype=jnp.float32, fuse_layers=False,
                    split_k_dot=True))
    assert out_unfused.shape == (N, out_ch)
    assert jnp.allclose(out_unfused, ref, atol=1e-4, rtol=1e-4), "unfused mismatch"

    print("KERNEL_OK")
</pallas_src>

<mosaic_0001>
module attributes {stable_mosaic.version = 11 : i64} {
  func.func @_fused_cheb_gnn_kernel(%arg0: i32, %arg1: i32, %arg2: memref<16x128xf32, #tpu.memory_space<vmem>>, %arg3: memref<16x16xf32, #tpu.memory_space<vmem>>, %arg4: memref<256x128xf32, #tpu.memory_space<vmem>>, %arg5: memref<1x128xf32, #tpu.memory_space<vmem>>, %arg6: memref<256x128xf32, #tpu.memory_space<vmem>>, %arg7: memref<1x128xf32, #tpu.memory_space<vmem>>, %arg8: memref<16x128xf32, #tpu.memory_space<vmem>>, %arg9: memref<16x128xf32, #tpu.memory_space<vmem>>) attributes {dimension_semantics = [#tpu.dimension_semantics<arbitrary>, #tpu.dimension_semantics<arbitrary>], iteration_bounds = array<i64: 2, 1>, scalar_prefetch = 0 : i64, scratch_operands = 1 : i64, tpu.core_type = #tpu.core_type<tc>, window_params = [{pipeline_mode = #tpu.pipeline_mode<synchronous>, transform_indices = @transform_0, window_bounds = array<i64: 16, 128>}, {pipeline_mode = #tpu.pipeline_mode<synchronous>, transform_indices = @transform_1, window_bounds = array<i64: 16, 16>}, {pipeline_mode = #tpu.pipeline_mode<synchronous>, transform_indices = @transform_2, window_bounds = array<i64: 256, 128>}, {pipeline_mode = #tpu.pipeline_mode<synchronous>, transform_indices = @transform_3, window_bounds = array<i64: 1, 128>}, {pipeline_mode = #tpu.pipeline_mode<synchronous>, transform_indices = @transform_4, window_bounds = array<i64: 256, 128>}, {pipeline_mode = #tpu.pipeline_mode<synchronous>, transform_indices = @transform_5, window_bounds = array<i64: 1, 128>}, {transform_indices = @transform_6, window_bounds = array<i64: 16, 128>}]} {
    %c16_i32 = arith.constant 16 : i32
    %0 = arith.muli %arg1, %c16_i32 : i32
    %1 = tpu.assume_multiple %0, 16 : i32
    %c0_i32 = arith.constant 0 : i32
    %2 = arith.cmpi eq, %arg0, %c0_i32 : i32
    %3 = arith.extui %2 : i1 to i32
    %c0_i32_0 = arith.constant 0 : i32
    %4 = arith.cmpi ne, %3, %c0_i32_0 : i32
    scf.if %4 {
      %8 = arith.index_cast %1 : i32 to index
      %c0 = arith.constant 0 : index
      %9 = vector.load %arg3[%8, %c0] : memref<16x16xf32, #tpu.memory_space<vmem>>, vector<16x16xf32>
      %c0_2 = arith.constant 0 : index
      %c0_3 = arith.constant 0 : index
      %10 = vector.load %arg2[%c0_2, %c0_3] : memref<16x128xf32, #tpu.memory_space<vmem>>, vector<16x128xf32>
      %cst = arith.constant dense<0.000000e+00> : vector<16x128xf32>
      %11 = tpu.matmul %9, %10, %cst {dimension_numbers = #tpu.dot_dimension_numbers<[1], [0], [0], [1], [0, 0, 1, 1], [], []>} : vector<16x16xf32>, vector<16x128xf32>, vector<16x128xf32> -> vector<16x128xf32>
      %12 = arith.index_cast %1 : i32 to index
      %c0_4 = arith.constant 0 : index
      %13 = vector.load %arg2[%12, %c0_4] : memref<16x128xf32, #tpu.memory_space<vmem>>, vector<16x128xf32>
      %14 = tpu.concatenate %13, %11 in 1 : vector<16x128xf32>, vector<16x128xf32> -> vector<16x256xf32>
      %c0_5 = arith.constant 0 : index
      %c0_6 = arith.constant 0 : index
      %15 = vector.load %arg4[%c0_5, %c0_6] : memref<256x128xf32, #tpu.memory_space<vmem>>, vector<256x128xf32>
      %cst_7 = arith.constant dense<0.000000e+00> : vector<16x128xf32>
      %16 = tpu.matmul %14, %15, %cst_7 {dimension_numbers = #tpu.dot_dimension_numbers<[1], [0], [0], [1], [0, 0, 1, 1], [], []>} : vector<16x256xf32>, vector<256x128xf32>, vector<16x128xf32> -> vector<16x128xf32>
      %c0_8 = arith.constant 0 : index
      %c0_9 = arith.constant 0 : index
      %17 = vector.load %arg5[%c0_8, %c0_9] : memref<1x128xf32, #tpu.memory_space<vmem>>, vector<1x128xf32>
      %18 = vector.broadcast %17 : vector<1x128xf32> to vector<16x128xf32>
      %19 = arith.addf %16, %18 : vector<16x128xf32>
      %cst_10 = arith.constant 0.000000e+00 : f32
      %20 = vector.broadcast %cst_10 : f32 to vector<16x128xf32>
      %21 = arith.maximumf %19, %20 : vector<16x128xf32>
      %22 = arith.index_cast %1 : i32 to index
      %c0_11 = arith.constant 0 : index
      %23 = vector.load %arg9[%22, %c0_11] : memref<16x128xf32, #tpu.memory_space<vmem>>, vector<16x128xf32>
      tpu.vector_store %arg9[%22, %c0_11], %21 {strides = array<i32>} : memref<16x128xf32, #tpu.memory_space<vmem>>, vector<16x128xf32>,
    } else {
    }
    %c1_i32 = arith.constant 1 : i32
    %5 = arith.cmpi eq, %arg0, %c1_i32 : i32
    %6 = arith.extui %5 : i1 to i32
    %c0_i32_1 = arith.constant 0 : i32
    %7 = arith.cmpi ne, %6, %c0_i32_1 : i32
    scf.if %7 {
      %8 = arith.index_cast %1 : i32 to index
      %c0 = arith.constant 0 : index
      %9 = vector.load %arg3[%8, %c0] : memref<16x16xf32, #tpu.memory_space<vmem>>, vector<16x16xf32>
      %c0_2 = arith.constant 0 : index
      %c0_3 = arith.constant 0 : index
      %10 = vector.load %arg9[%c0_2, %c0_3] : memref<16x128xf32, #tpu.memory_space<vmem>>, vector<16x128xf32>
      %cst = arith.constant dense<0.000000e+00> : vector<16x128xf32>
      %11 = tpu.matmul %9, %10, %cst {dimension_numbers = #tpu.dot_dimension_numbers<[1], [0], [0], [1], [0, 0, 1, 1], [], []>} : vector<16x16xf32>, vector<16x128xf32>, vector<16x128xf32> -> vector<16x128xf32>
      %12 = arith.index_cast %1 : i32 to index
      %c0_4 = arith.constant 0 : index
      %13 = vector.load %arg9[%12, %c0_4] : memref<16x128xf32, #tpu.memory_space<vmem>>, vector<16x128xf32>
      %14 = tpu.concatenate %13, %11 in 1 : vector<16x128xf32>, vector<16x128xf32> -> vector<16x256xf32>
      %c0_5 = arith.constant 0 : index
      %c0_6 = arith.constant 0 : index
      %15 = vector.load %arg6[%c0_5, %c0_6] : memref<256x128xf32, #tpu.memory_space<vmem>>, vector<256x128xf32>
      %cst_7 = arith.constant dense<0.000000e+00> : vector<16x128xf32>
      %16 = tpu.matmul %14, %15, %cst_7 {dimension_numbers = #tpu.dot_dimension_numbers<[1], [0], [0], [1], [0, 0, 1, 1], [], []>} : vector<16x256xf32>, vector<256x128xf32>, vector<16x128xf32> -> vector<16x128xf32>
      %c0_8 = arith.constant 0 : index
      %c0_9 = arith.constant 0 : index
      %17 = vector.load %arg7[%c0_8, %c0_9] : memref<1x128xf32, #tpu.memory_space<vmem>>, vector<1x128xf32>
      %18 = vector.broadcast %17 : vector<1x128xf32> to vector<16x128xf32>
      %19 = arith.addf %16, %18 : vector<16x128xf32>
      %c0_10 = arith.constant 0 : index
      %c0_11 = arith.constant 0 : index
      %20 = vector.load %arg8[%c0_10, %c0_11] : memref<16x128xf32, #tpu.memory_space<vmem>>, vector<16x128xf32>
      tpu.vector_store %arg8[%c0_10, %c0_11], %19 {strides = array<i32>} : memref<16x128xf32, #tpu.memory_space<vmem>>, vector<16x128xf32>,
    } else {
    }
    return
  }
  func.func @transform_0(%arg0: i32, %arg1: i32) -> (i32, i32) {
    %c0_i32 = arith.constant 0 : i32
    %c0_i32_0 = arith.constant 0 : i32
    %c0_i32_1 = arith.constant 0 : i32
    return %c0_i32, %c0_i32_0 : i32, i32
  }
  func.func @transform_1(%arg0: i32, %arg1: i32) -> (i32, i32) {
    %c0_i32 = arith.constant 0 : i32
    %c0_i32_0 = arith.constant 0 : i32
    %c0_i32_1 = arith.constant 0 : i32
    return %c0_i32, %c0_i32_0 : i32, i32
  }
  func.func @transform_2(%arg0: i32, %arg1: i32) -> (i32, i32) {
    %c0_i32 = arith.constant 0 : i32
    %c0_i32_0 = arith.constant 0 : i32
    %c0_i32_1 = arith.constant 0 : i32
    return %c0_i32, %c0_i32_0 : i32, i32
  }
  func.func @transform_3(%arg0: i32, %arg1: i32) -> (i32, i32) {
    %c0_i32 = arith.constant 0 : i32
    %c0_i32_0 = arith.constant 0 : i32
    %c0_i32_1 = arith.constant 0 : i32
    return %c0_i32, %c0_i32_0 : i32, i32
  }
  func.func @transform_4(%arg0: i32, %arg1: i32) -> (i32, i32) {
    %c0_i32 = arith.constant 0 : i32
    %c0_i32_0 = arith.constant 0 : i32
    %c0_i32_1 = arith.constant 0 : i32
    return %c0_i32, %c0_i32_0 : i32, i32
  }
  func.func @transform_5(%arg0: i32, %arg1: i32) -> (i32, i32) {
    %c0_i32 = arith.constant 0 : i32
    %c0_i32_0 = arith.constant 0 : i32
    %c0_i32_1 = arith.constant 0 : i32
    return %c0_i32, %c0_i32_0 : i32, i32
  }
  func.func @transform_6(%arg0: i32, %arg1: i32) -> (i32, i32) {
    %0 = arith.muli %arg1, %arg0 : i32
    %c0_i32 = arith.constant 0 : i32
    %c0_i32_0 = arith.constant 0 : i32
    return %0, %c0_i32 : i32, i32
  }
}

</mosaic_0001>

<bundles_post_ra>
// kernel: tpu_custom_call.1
= control target key start
LH: loop header
LB: loop body
LE: loop exit
PB: predicated region body
PF: predicated region fallthrough
CT: control target
= control target key end

     0   :  { %11 = vsyncpa [#allocation4], 0  ;;  %s1431_s0 = inlined_call_operand.hbm [shape: f32[16,128], index: 0, kind: input, shape index: {}]   ;;  %s1432_s1 = inlined_call_operand.hbm [shape: f32[16,16], index: 1, kind: input, shape index: {}]   ;;  %s1433_s2 = inlined_call_operand.hbm [shape: f32[256,128], index: 2, kind: input, shape index: {}]   ;;  %s1434_s3 = inlined_call_operand.vmem [shape: f32[1,128], index: 3, kind: input, shape index: {}]   ;;  %s1435_s4 = inlined_call_operand.hbm [shape: f32[256,128], index: 4, kind: input, shape index: {}]   ;;  %s1436_s5 = inlined_call_operand.vmem [shape: f32[1,128], index: 5, kind: input, shape index: {}]   ;;  %s1437_s6 = inlined_call_operand.hbm [shape: f32[16,128], index: 6, kind: output, shape index: {}]  }
   0x1   :  { %12 = vsyncpa [#allocation7], 0 }
   0x2   :  { %13 = vsyncpa [#allocation10], 0 }
   0x3   :  { %14 = vsyncpa [#allocation5], 0 }
   0x4   :  { %16 = vsyncpa [#allocation5 + $0x1], 0  ;;  %s1268_s21 = smov 0   ;;  %s1270_s22 = smov 0  }
   0x5   :  { %s1272_s23 = smov 0  }
   0x6 LB: > { %s853_s24 = sadd.s32 4294967295, %s1222_s23   ;;  %s854_s25 = sadd.s32 4294967294, %s1222_s23   ;;  %s1222_s23 = sphi %s1272_s23, %s22_s23   ;;  %s1218_s22 = sphi %s1270_s22, %s1444_s22   ;;  %s1214_s21 = sphi %s1268_s21, %s1443_s21  }
   0x7   : > { %p855_p0 = scmp.ge.s32.totalorder %s1222_s23, 1  ;;  %p193_p1 = scmp.lt.s32.totalorder %s1222_s23, 3 }
   0x8   : > { %p1289_p2 = scmp.eq.s32.totalorder %s853_s24, 0  ;;  %s1224_s28 = smov [#allocation6]  }
   0x9   : > { %p1293_p3 = pnand %p855_p0, %p193_p1  ;;  %s218_s29 = sshll.u32 %s1224_s28, 4  ;;  %s219_s29 = int_to_ptr.vmem [resolvable:$true] %s218_s29 }
   0xa   : > { %s34_s7 = sadd.s32 1, %s1218_s22  ;;  %s1067_s9 = scalar_lea.vmem %s219_s29, 256 }
   0xb   : > { %p995_p4 = pneg %p1293_p3  ;;  %p1306_p6 = scmp.ge.s32.totalorder %s34_s7, 2 }
   0xc   : > { %p1068_p8 = scmp.ne.s32.totalorder %s219_s29, %s1067_s9  ;;  %p1075_p11 = scmp.lt.s32.totalorder %s219_s29, %s219_s29 }
   0xd   : > { %p1301_p5 = pnand %p1289_p2, %p995_p4  ;;  %p1076_p12 = scmp.lt.s32.totalorder %s1067_s9, %s1067_s9 }
   0xf   : > { %p1058_p7 = pneg %p1301_p5  ;;  %p1077_p13 = por %p1076_p12, %p1075_p11 }
  0x11   : > { %p1070_p9 = pnand %p1068_p8, %p1058_p7 }
  0x13   : > { %p1071_p10 = pneg %p1070_p9 }
  0x15   : > { %p1078_p0 = pnand %p1077_p13, %p1071_p10 }
  0x17   : > { %1081 = shalt.err (!%p1078_p0)
}
  0x18   : > { %s1225_s10 = smov 128   ;;  %s1226_s11 = smov 8  }
  0x19   : > { %1001 = dma.hbm_to_vmem [thread:$0]  (!%p1301_p5), %s1432_s1, 256, %s219_s29, [#allocation7], %s1225_s10, %s1225_s10, %s1226_s11  }
  0x1a   : > { %s1446_s7 = smov (%p1306_p6, %s34_s7), 0  ;;  %s1227_s14 = smov [#allocation3]  }
  0x1b   : > { %s205_s15 = sshll.u32 %s1227_s14, 4  ;;  %s1228_s16 = smov [#allocation8]   ;;  %s206_s15 = int_to_ptr.vmem [resolvable:$true] %s205_s15 }
  0x1c   : > { %s231_s17 = sshll.u32 %s1228_s16, 4  ;;  %s1093_s18 = scalar_lea.vmem %s206_s15, 256  ;;  %s232_s17 = int_to_ptr.vmem [resolvable:$true] %s231_s17 }
  0x1d   : > { %p1094_p1 = scmp.ne.s32.totalorder %s206_s15, %s1093_s18  ;;  %p1101_p9 = scmp.lt.s32.totalorder %s206_s15, %s206_s15 }
  0x1e   : > { %p1102_p10 = scmp.lt.s32.totalorder %s1093_s18, %s1093_s18 }
  0x1f   : > { %p1096_p4 = pnand %p1094_p1, %p1058_p7 }
  0x20   : > { %p1103_p11 = por %p1102_p10, %p1101_p9 }
  0x21   : > { %p1097_p8 = pneg %p1096_p4 }
  0x23   : > { %p1104_p12 = pnand %p1103_p11, %p1097_p8 }
  0x25   : > { %1107 = shalt.err (!%p1104_p12)
}
  0x26   : > { %998 = dma.hbm_to_vmem [thread:$0]  (!%p1301_p5), %s1431_s0, 256, %s206_s15, [#allocation4], %s1225_s10, %s1225_s10, %s1226_s11  }
  0x27   : > { %s1119_s28 = scalar_lea.vmem %s232_s17, 4096  ;;  %p1127_p1 = scmp.lt.s32.totalorder %s232_s17, %s232_s17 }
  0x28   : > { %p1120_p6 = scmp.ne.s32.totalorder %s232_s17, %s1119_s28  ;;  %p1128_p4 = scmp.lt.s32.totalorder %s1119_s28, %s1119_s28 }
  0x2a   : > { %p1122_p13 = pnand %p1120_p6, %p1058_p7  ;;  %p1129_p8 = por %p1128_p4, %p1127_p1 }
  0x2c   : > { %p1123_p0 = pneg %p1122_p13 }
  0x2e   : > { %p1130_p9 = pnand %p1129_p8, %p1123_p0 }
  0x30   : > { %1133 = shalt.err (!%p1130_p9)
}
  0x31   : > { %1004 = dma.hbm_to_vmem [thread:$0]  (!%p1301_p5), %s1433_s2, 4096, %s232_s17, [#allocation7], %s1225_s10, %s1225_s10, %s1226_s11  }
  0x32   : > { %s1229_s9 = smov [#allocation9]  }
  0x33   : > { %s247_s12 = sshll.u32 %s1229_s9, 4  ;;  %s248_s12 = int_to_ptr.vmem [resolvable:$true] %s247_s12 }
  0x34   : > { %s1145_s13 = scalar_lea.vmem %s248_s12, 4096  ;;  %p1153_p6 = scmp.lt.s32.totalorder %s248_s12, %s248_s12 }
  0x35   : > { %p1146_p10 = scmp.ne.s32.totalorder %s248_s12, %s1145_s13  ;;  %p1154_p13 = scmp.lt.s32.totalorder %s1145_s13, %s1145_s13 }
  0x37   : > { %p1148_p11 = pnand %p1146_p10, %p1058_p7  ;;  %p1155_p0 = por %p1154_p13, %p1153_p6 }
  0x39   : > { %p1149_p12 = pneg %p1148_p11 }
  0x3b   : > { %p1156_p1 = pnand %p1155_p0, %p1149_p12 }
  0x3d   : > { %1159 = shalt.err (!%p1156_p1)
}
  0x3e   : > { %1007 = dma.hbm_to_vmem [thread:$0]  (!%p1301_p5), %s1435_s4, 4096, %s248_s12, [#allocation10], %s1225_s10, %s1225_s10, %s1226_s11  }
  0x3f   : > { %266 = sbr.rel (%p1293_p3) target bundleno = 913 (0x391), region = 44 }
  0x44   : > { %1197 = dma.done.wait (%p1289_p2), [#allocation4], 256  }
  0x45   : > { %1199 = vsyncadd (%p1289_p2), [#allocation4], 4294967040 }
  0x46   : > { %1201 = dma.done.wait (%p1289_p2), [#allocation7], 4352  }
  0x47   : > { %1203 = vsyncadd (%p1289_p2), [#allocation7], 4294962944 }
  0x48   : > { %1205 = dma.done.wait (%p1289_p2), [#allocation10], 4096  }
  0x49   : > { %1207 = vsyncadd (%p1289_p2), [#allocation10], 4294963200  ;;  %p865_p3 = scmp.ne.s32.totalorder %s1214_s21, 0 }
  0x4b   : > { %309 = sbr.rel (%p865_p3) target bundleno = 487 (0x1e7), region = 64 }
  0x50   : > { %v1375_v0 = vld [vmem:[#allocation3 + $0x8] sm:$0xff]  ;;  %v1377_v1 = vld [vmem:[#allocation3] sm:$0xff]  ;;  %v311_v2 = vld [vmem:[#allocation6] sm:$0xff]  ;;  %vm315_vm0 = vcmask 130048  }
  0x51   : > { %961 = vmatprep.subr.mxu0 %v1375_v0  ;;  %965 = vmatprep.mubr.msk.f32.mxu0 %vm315_vm0, %v311_v2  ;;  %v431_v3 = vld [vmem:[#allocation8 + $0xf8] sm:$0xff]  ;;  %v430_v6 = vld [vmem:[#allocation8 + $0xf0] sm:$0xff]  ;;  %v429_v8 = vld [vmem:[#allocation8 + $0xe8] sm:$0xff] }
  0x52   : > { %v415_v4 = vld [vmem:[#allocation8 + $0x78] sm:$0xff]  ;;  %962 = vmatpush3.msra.mxu0 %v1375_v0  ;;  %881 = vmatprep.subr.mxu1 %v431_v3  ;;  %v414_v7 = vld [vmem:[#allocation8 + $0x70] sm:$0xff]  ;;  %v413_v9 = vld [vmem:[#allocation8 + $0x68] sm:$0xff] }
  0x53   : > { %v312_v5 = vld [vmem:[#allocation6 + $0x8] sm:$0xff]  ;;  %963 = vmatprep.subr.mxu0 %v1377_v1  ;;  %882 = vmatpush3.msra.mxu1 %v415_v4  ;;  %v428_v10 = vld [vmem:[#allocation8 + $0xe0] sm:$0xff]  ;;  %v426_v14 = vld [vmem:[#allocation8 + $0xd0] sm:$0xff] }
  0x54   : > { %964 = vmatpush3.msra.mxu0 %v1377_v1  ;;  %883 = vmatprep.subr.mxu1 %v430_v6  ;;  %v412_v11 = vld [vmem:[#allocation8 + $0x60] sm:$0xff]  ;;  %v427_v12 = vld [vmem:[#allocation8 + $0xd8] sm:$0xff]  ;;  %v410_v15 = vld [vmem:[#allocation8 + $0x50] sm:$0xff] }
  0x55   : > { %966 = vmatmul.mubr.msk.f32.vlgmr.msra.gmra.mxu0 %vm315_vm0, %v312_v5  ;;  %884 = vmatpush3.msra.mxu1 %v414_v7  ;;  %v411_v13 = vld [vmem:[#allocation8 + $0x58] sm:$0xff]  ;;  %v425_v16 = vld [vmem:[#allocation8 + $0xc8] sm:$0xff]  ;;  %v424_v18 = vld [vmem:[#allocation8 + $0xc0] sm:$0xff] }
  0x56   : > { %885 = vmatprep.subr.mxu1 %v429_v8  ;;  %v409_v17 = vld [vmem:[#allocation8 + $0x48] sm:$0xff]  ;;  %v408_v19 = vld [vmem:[#allocation8 + $0x40] sm:$0xff]  ;;  %v423_v20 = vld [vmem:[#allocation8 + $0xb8] sm:$0xff] }
  0x57   : > { %886 = vmatpush3.msra.mxu1 %v413_v9  ;;  %v407_v21 = vld [vmem:[#allocation8 + $0x38] sm:$0xff]  ;;  %v422_v22 = vld [vmem:[#allocation8 + $0xb0] sm:$0xff]  ;;  %v421_v24 = vld [vmem:[#allocation8 + $0xa8] sm:$0xff] }
  0x58   : > { %887 = vmatprep.subr.mxu1 %v428_v10  ;;  %v406_v23 = vld [vmem:[#allocation8 + $0x30] sm:$0xff]  ;;  %v405_v25 = vld [vmem:[#allocation8 + $0x28] sm:$0xff]  ;;  %v420_v26 = vld [vmem:[#allocation8 + $0xa0] sm:$0xff] }
  0x59   : > { %888 = vmatpush3.msra.mxu1 %v412_v11  ;;  %v404_v27 = vld [vmem:[#allocation8 + $0x20] sm:$0xff]  ;;  %v419_v28 = vld [vmem:[#allocation8 + $0x98] sm:$0xff]  ;;  %v418_v30 = vld [vmem:[#allocation8 + $0x90] sm:$0xff] }
  0x5a   : > { %889 = vmatprep.subr.mxu1 %v427_v12  ;;  %v403_v29 = vld [vmem:[#allocation8 + $0x18] sm:$0xff]  ;;  %v402_v31 = vld [vmem:[#allocation8 + $0x10] sm:$0xff]  ;;  %v417_v32 = vld [vmem:[#allocation8 + $0x88] sm:$0xff] }
  0x5b   : > { %890 = vmatpush3.msra.mxu1 %v411_v13  ;;  %v401_v33 = vld [vmem:[#allocation8 + $0x8] sm:$0xff]  ;;  %v416_v34 = vld [vmem:[#allocation8 + $0x80] sm:$0xff]  ;;  %v868_v39 = vld [vmem:[%s1434_s3] ss:$0 sm:$0xff] }
  0x5c   : > { %891 = vmatprep.subr.mxu1 %v426_v14  ;;  %v400_v35 = vld [vmem:[#allocation8] sm:$0xff] }
  0x5d   : > { %892 = vmatpush3.msra.mxu1 %v410_v15 }
  0x5e   : > { %893 = vmatprep.subr.mxu1 %v425_v16 }
  0x5f   : > { %894 = vmatpush3.msra.mxu1 %v409_v17 }
  0x60   : > { %895 = vmatprep.subr.mxu1 %v424_v18 }
  0x61   : > { %896 = vmatpush3.msra.mxu1 %v408_v19 }
  0x62   : > { %897 = vmatprep.subr.mxu1 %v423_v20 }
  0x63   : > { %898 = vmatpush3.msra.mxu1 %v407_v21 }
  0x64   : > { %899 = vmatprep.subr.mxu1 %v422_v22 }
  0x65   : > { %900 = vmatpush3.msra.mxu1 %v406_v23 }
  0x66   : > { %901 = vmatprep.subr.mxu1 %v421_v24 }
  0x67   : > { %902 = vmatpush3.msra.mxu1 %v405_v25 }
  0x68   : > { %903 = vmatprep.subr.mxu1 %v420_v26 }
  0x69   : > { %904 = vmatpush3.msra.mxu1 %v404_v27 }
  0x6a   : > { %905 = vmatprep.subr.mxu1 %v419_v28 }
  0x6b   : > { %906 = vmatpush3.msra.mxu1 %v403_v29 }
  0x6c   : > { %907 = vmatprep.subr.mxu1 %v418_v30 }
  0x6d   : > { %908 = vmatpush3.msra.mxu1 %v402_v31 }
  0x6e   : > { %909 = vmatprep.subr.mxu1 %v417_v32 }
  0x6f   : > { %910 = vmatpush3.msra.mxu1 %v401_v33 }
  0x70   : > { %911 = vmatprep.subr.mxu1 %v416_v34 }
  0x71   : > { %912 = vmatpush3.msra.mxu1 %v400_v35 }
 0x115   : > { %v967_v36 = vpop.f32.mrf.mxu0 }
 0x117   : > { %v388_v37 = vpop.f32.mrf.mxu0 }
 0x118   : > { %503 = vmatprep.mubr.f32.mxu1 %v388_v37 }
 0x119   : > { %504 = vmatmul.mubr.f32.vlgmr.msra.gmra.mxu1 %v1377_v1 }
 0x11a   : > { %508 = vmatprep.mubr.f32.mxu1 %v967_v36 }
 0x11d   : > { %509 = vmatmul.mubr.f32.gmra.mxu1 %v1375_v0 }
 0x1d9   : > { %v913_v38 = vpop.f32.mrf.mxu1 }
 0x1db   : > { %v914_v40 = vpop.f32.mrf.mxu1 }
 0x1dc   : > { %v915_v41 = vadd.f32 %v914_v40, %v913_v38 }
 0x1dd   : > { %v916_v42 = vpop.f32.mrf.mxu1 }
 0x1de   : > { %v506_v43 = vadd.f32 %v915_v41, %v868_v39 }
 0x1df   : > { %v917_v44 = vpop.f32.mrf.mxu1 }
 0x1e0   : > { %v514_v45 = vmax.f32 %v506_v43, 0.0  ;;  %v918_v46 = vadd.f32 %v917_v44, %v916_v42 }
 0x1e2   : > { %517 = vst [vmem:[#allocation2] sm:$0xff] %v514_v45  ;;  %v511_v47 = vadd.f32 %v918_v46, %v868_v39 }
 0x1e4   : > { %v515_v48 = vmax.f32 %v511_v47, 0.0 }
 0x1e6   : > { %518 = vst [vmem:[#allocation2 + $0x8] sm:$0xff] %v515_v48 }
 0x1e7 PF: > { %p869_p2 = scmp.ne.s32.totalorder %s1214_s21, 1 }
 0x1e9   : > { %522 = sbr.rel (%p869_p2) target bundleno = 899 (0x383), region = 68 }
 0x1ee   : > { %v1391_v49 = vld [vmem:[#allocation2 + $0x8] sm:$0xff]  ;;  %v1393_v50 = vld [vmem:[#allocation2] sm:$0xff]  ;;  %vm528_vm1 = vcmask 130048   ;;  %v642_v57 = vld [vmem:[#allocation9 + $0xe8] sm:$0xff] }
 0x1ef   : > { %v524_v51 = vld [vmem:[#allocation6] sm:$0xff]  ;;  %968 = vmatprep.subr.mxu0 %v1391_v49  ;;  %v644_v52 = vld [vmem:[#allocation9 + $0xf8] sm:$0xff]  ;;  %v626_v58 = vld [vmem:[#allocation9 + $0x68] sm:$0xff] }
 0x1f0   : > { %972 = vmatprep.mubr.msk.f32.mxu0 %vm528_vm1, %v524_v51  ;;  %v628_v53 = vld [vmem:[#allocation9 + $0x78] sm:$0xff]  ;;  %969 = vmatpush3.msra.mxu0 %v1391_v49  ;;  %v643_v55 = vld [vmem:[#allocation9 + $0xf0] sm:$0xff]  ;;  %v641_v59 = vld [vmem:[#allocation9 + $0xe0] sm:$0xff] }
 0x1f1   : > { %v525_v54 = vld [vmem:[#allocation6 + $0x8] sm:$0xff]  ;;  %923 = vmatprep.subr.mxu1 %v644_v52  ;;  %v627_v56 = vld [vmem:[#allocation9 + $0x70] sm:$0xff]  ;;  %970 = vmatprep.subr.mxu0 %v1393_v50  ;;  %v625_v60 = vld [vmem:[#allocation9 + $0x60] sm:$0xff] }
 0x1f2   : > { %924 = vmatpush3.msra.mxu1 %v628_v53  ;;  %971 = vmatpush3.msra.mxu0 %v1393_v50  ;;  %v640_v61 = vld [vmem:[#allocation9 + $0xd8] sm:$0xff]  ;;  %v639_v63 = vld [vmem:[#allocation9 + $0xd0] sm:$0xff]  ;;  %v638_v1 = vld [vmem:[#allocation9 + $0xc8] sm:$0xff] }
 0x1f3   : > { %925 = vmatprep.subr.mxu1 %v643_v55  ;;  %973 = vmatmul.mubr.msk.f32.vlgmr.msra.gmra.mxu0 %vm528_vm1, %v525_v54  ;;  %v624_v62 = vld [vmem:[#allocation9 + $0x58] sm:$0xff]  ;;  %v623_v0 = vld [vmem:[#allocation9 + $0x50] sm:$0xff]  ;;  %v622_v2 = vld [vmem:[#allocation9 + $0x48] sm:$0xff] }
 0x1f4   : > { %926 = vmatpush3.msra.mxu1 %v627_v56  ;;  %v637_v3 = vld [vmem:[#allocation9 + $0xc0] sm:$0xff]  ;;  %v636_v5 = vld [vmem:[#allocation9 + $0xb8] sm:$0xff]  ;;  %v635_v7 = vld [vmem:[#allocation9 + $0xb0] sm:$0xff] }
 0x1f5   : > { %927 = vmatprep.subr.mxu1 %v642_v57  ;;  %v621_v4 = vld [vmem:[#allocation9 + $0x40] sm:$0xff]  ;;  %v620_v6 = vld [vmem:[#allocation9 + $0x38] sm:$0xff]  ;;  %v619_v8 = vld [vmem:[#allocation9 + $0x30] sm:$0xff] }
 0x1f6   : > { %928 = vmatpush3.msra.mxu1 %v626_v58  ;;  %v634_v9 = vld [vmem:[#allocation9 + $0xa8] sm:$0xff]  ;;  %v633_v11 = vld [vmem:[#allocation9 + $0xa0] sm:$0xff]  ;;  %v632_v13 = vld [vmem:[#allocation9 + $0x98] sm:$0xff] }
 0x1f7   : > { %929 = vmatprep.subr.mxu1 %v641_v59  ;;  %v618_v10 = vld [vmem:[#allocation9 + $0x28] sm:$0xff]  ;;  %v617_v12 = vld [vmem:[#allocation9 + $0x20] sm:$0xff]  ;;  %v616_v14 = vld [vmem:[#allocation9 + $0x18] sm:$0xff] }
 0x1f8   : > { %930 = vmatpush3.msra.mxu1 %v625_v60  ;;  %v631_v15 = vld [vmem:[#allocation9 + $0x90] sm:$0xff]  ;;  %v630_v17 = vld [vmem:[#allocation9 + $0x88] sm:$0xff]  ;;  %v629_v19 = vld [vmem:[#allocation9 + $0x80] sm:$0xff] }
 0x1f9   : > { %931 = vmatprep.subr.mxu1 %v640_v61  ;;  %v615_v16 = vld [vmem:[#allocation9 + $0x10] sm:$0xff]  ;;  %v614_v18 = vld [vmem:[#allocation9 + $0x8] sm:$0xff]  ;;  %v613_v20 = vld [vmem:[#allocation9] sm:$0xff] }
 0x1fa   : > { %932 = vmatpush3.msra.mxu1 %v624_v62  ;;  %v872_v24 = vld [vmem:[%s1436_s5] ss:$0 sm:$0xff] }
 0x1fb   : > { %933 = vmatprep.subr.mxu1 %v639_v63 }
 0x1fc   : > { %934 = vmatpush3.msra.mxu1 %v623_v0 }
 0x1fd   : > { %935 = vmatprep.subr.mxu1 %v638_v1 }
 0x1fe   : > { %936 = vmatpush3.msra.mxu1 %v622_v2 }
 0x1ff   : > { %937 = vmatprep.subr.mxu1 %v637_v3 }
 0x200   : > { %938 = vmatpush3.msra.mxu1 %v621_v4 }
 0x201   : > { %939 = vmatprep.subr.mxu1 %v636_v5 }
 0x202   : > { %940 = vmatpush3.msra.mxu1 %v620_v6 }
 0x203   : > { %941 = vmatprep.subr.mxu1 %v635_v7 }
 0x204   : > { %942 = vmatpush3.msra.mxu1 %v619_v8 }
 0x205   : > { %943 = vmatprep.subr.mxu1 %v634_v9 }
 0x206   : > { %944 = vmatpush3.msra.mxu1 %v618_v10 }
 0x207   : > { %945 = vmatprep.subr.mxu1 %v633_v11 }
 0x208   : > { %946 = vmatpush3.msra.mxu1 %v617_v12 }
 0x209   : > { %947 = vmatprep.subr.mxu1 %v632_v13 }
 0x20a   : > { %948 = vmatpush3.msra.mxu1 %v616_v14 }
 0x20b   : > { %949 = vmatprep.subr.mxu1 %v631_v15 }
 0x20c   : > { %950 = vmatpush3.msra.mxu1 %v615_v16 }
 0x20d   : > { %951 = vmatprep.subr.mxu1 %v630_v17 }
 0x20e   : > { %952 = vmatpush3.msra.mxu1 %v614_v18 }
 0x20f   : > { %953 = vmatprep.subr.mxu1 %v629_v19 }
 0x210   : > { %954 = vmatpush3.msra.mxu1 %v613_v20 }
 0x2b3   : > { %v974_v21 = vpop.f32.mrf.mxu0 }
 0x2b5   : > { %v601_v22 = vpop.f32.mrf.mxu0 }
 0x2b6   : > { %716 = vmatprep.mubr.f32.mxu1 %v601_v22 }
 0x2b7   : > { %717 = vmatmul.mubr.f32.vlgmr.msra.gmra.mxu1 %v1393_v50 }
 0x2b8   : > { %721 = vmatprep.mubr.f32.mxu1 %v974_v21 }
 0x2bb   : > { %722 = vmatmul.mubr.f32.gmra.mxu1 %v1391_v49 }
 0x377   : > { %v955_v23 = vpop.f32.mrf.mxu1 }
 0x379   : > { %v956_v25 = vpop.f32.mrf.mxu1 }
 0x37a   : > { %v957_v26 = vadd.f32 %v956_v25, %v955_v23 }
 0x37b   : > { %v958_v27 = vpop.f32.mrf.mxu1 }
 0x37c   : > { %v719_v28 = vadd.f32 %v957_v26, %v872_v24 }
 0x37d   : > { %v959_v29 = vpop.f32.mrf.mxu1 }
 0x37e   : > { %727 = vst [vmem:[#allocation11] sm:$0xff] %v719_v28  ;;  %v960_v30 = vadd.f32 %v959_v29, %v958_v27 }
 0x380   : > { %v724_v31 = vadd.f32 %v960_v30, %v872_v24 }
 0x382   : > { %728 = vst [vmem:[#allocation11 + $0x8] sm:$0xff] %v724_v31 }
 0x383 PF: > { %p1408_p5 = scmp.eq.s32.totalorder %s853_s24, 1  ;;  %s1230_s11 = smov [#allocation11]  }
 0x384   : > { %s744_s16 = sshll.u32 %s1230_s11, 4  ;;  %s745_s16 = int_to_ptr.vmem [resolvable:$true] %s744_s16 }
 0x385   : > { %s1160_s17 = scalar_lea.vmem %s745_s16, 256  ;;  %s1166_s18 = scalar_lea.vmem %s745_s16, 512 }
 0x386   : > { %p1161_p7 = scmp.ne.s32.totalorder %s745_s16, %s1160_s17  ;;  %p1167_p9 = scmp.lt.s32.totalorder %s745_s16, %s745_s16 }
 0x387   : > { %p1168_p10 = scmp.lt.s32.totalorder %s1166_s18, %s1160_s17 }
 0x388   : > { %p1162_p4 = pnand %p1161_p7, %p1408_p5 }
 0x389   : > { %p1169_p11 = por %p1168_p10, %p1167_p9 }
 0x38a   : > { %p1163_p8 = pneg %p1162_p4 }
 0x38c   : > { %p1170_p12 = pnand %p1169_p11, %p1163_p8 }
 0x38e   : > { %1173 = shalt.err (!%p1170_p12)
}
 0x38f   : > { %s1231_s19 = smov 128   ;;  %s1232_s24 = smov 8  }
 0x390   : > { %992 = dma.vmem_to_hbm [thread:$0]  (%p1408_p5), %s745_s16, 256, %s1437_s6, [#allocation5], %s1231_s19, %s1231_s19, %s1232_s24  }
 0x391 PF: > { %p1021_p6 = scmp.ge.s32.totalorder %s1222_s23, 2  ;;  %p1022_p13 = scmp.eq.s32.totalorder %s854_s25, 1 }
 0x393   : > { %p1009_p0 = pnand %p1022_p13, %p1021_p6 }
 0x395   : > { %p1010_p1 = pneg %p1009_p0 }
 0x397   : > { %1209 = dma.done.wait (%p1010_p1), [#allocation5], 256  }
 0x398   : > { %1211 = vsyncadd (%p1010_p1), [#allocation5], 4294967040  ;;  %s22_s23 = sadd.s32 1, %s1222_s23   ;;  %s1443_s21 = smov %s1218_s22 }
 0x399   : > { %p19_p3 = scmp.ge.s32.totalorder %s22_s23, 4   ;;  %s1444_s22 = smov %s1446_s7 }
 0x39b   :  { %21 = sbr.rel (!%p19_p3) target bundleno = 6 (0x6), region = 106 }
 0x3a0   :  { %765 = vsyncpa [#allocation4], 1 }
 0x3a1   :  { %767 = vsyncpa [#allocation4 + $0x1], 1 }
 0x3a2   :  { %768 = vsyncpa [#allocation7], 1 }
 0x3a3   :  { %769 = vsyncpa [#allocation10], 1 }
 0x3a4   :  { %770 = vsyncpa [#allocation5], 1 }
 0x3a5   :  { %772 = vsyncpa [#allocation5 + $0x1], 1 }

</bundles_post_ra>
